<compile_context>
chip_gen: v6e
topology: v6e:2x2x1
jax: 0.10.0
libtpu: 0.0.40
codegen_flags: <defaults>
</compile_context>

<pallas_src>
import jax
import jax.numpy as jnp
from jax.experimental import pallas as pl
from jax.experimental.pallas import tpu as pltpu


def _perceptron_kernel(params_ref, x_ref, o_ref):
    # params_ref: SMEM f32[3] = [w00, w01, b]
    # x_ref:      VMEM f32[2, tr, C]   (feature, batch-rows, batch-lanes)
    # o_ref:      VMEM f32[tr, C]
    w0 = params_ref[0]
    w1 = params_ref[1]
    bias = params_ref[2]
    x0 = x_ref[0]                       # (tr, C), dense on sublanes + lanes
    x1 = x_ref[1]                       # (tr, C)
    z = x0 * w0 + x1 * w1 + bias        # VPU only
    o_ref[...] = jax.nn.sigmoid(z)      # EUP


def _layout_for_batch(B, target_tile_elems):
    """Pick a dense (R, C) batch layout and a row-tile tr.

    C: lane width (multiple of 128).  R: rows (padded to a multiple of tr,
    which is a multiple of 8).  Tile ~ target_tile_elems elements, but keep
    >= 2 grid steps when there is enough work (v7x megacore balance).
    """
    C = 512 if B >= (1 << 16) else 128
    R = -(-B // C)                                       # rows needed
    tr_cap = max(8, (target_tile_elems // C) // 8 * 8)   # tile-size target
    half = max(8, ((R + 15) // 16) * 8)                  # ~R/2, multiple of 8
    tr = min(tr_cap, half)
    R_pad = -(-R // tr) * tr
    return C, R_pad, tr


def perceptron_forward_feature_major(x_fm, w, b, *, target_tile_elems=512 * 1024):
    """x_fm: [2, B] f32 feature-major (row 0 = feature 0), w: [1, 2], b: [1].

    Returns [B, 1] f32.  Preferred entry point: no transpose pass needed.
    """
    B = x_fm.shape[1]
    C, R_pad, tr = _layout_for_batch(B, target_tile_elems)
    B_pad = R_pad * C

    x_fm = x_fm.astype(jnp.float32)
    if B_pad != B:
        x_fm = jnp.pad(x_fm, ((0, 0), (0, B_pad - B)))
    xt = x_fm.reshape(2, R_pad, C)       # contiguous reshape (no copy)

    # Pack the Linear(2, 1) parameters into one small SMEM-resident array.
    params = jnp.concatenate(
        [w.reshape(-1), b.reshape(-1)]).astype(jnp.float32)      # f32[3]

    out = pl.pallas_call(
        _perceptron_kernel,
        out_shape=jax.ShapeDtypeStruct((R_pad, C), jnp.float32),
        grid_spec=pltpu.PrefetchScalarGridSpec(
            num_scalar_prefetch=0,
            grid=(R_pad // tr,),
            in_specs=[
                # params: whole array in SMEM, read as scalars.
                pl.BlockSpec(memory_space=pltpu.MemorySpace.SMEM),
                # x: (2, tr, C) tiles along the batch-row axis.
                pl.BlockSpec((2, tr, C), lambda i: (0, i, 0)),
            ],
            out_specs=pl.BlockSpec((tr, C), lambda i: (i, 0)),
        ),
        compiler_params=pltpu.CompilerParams(
            dimension_semantics=("parallel",)),   # shards batch across TCs
        cost_estimate=pl.CostEstimate(
            flops=4 * B_pad,
            transcendentals=B_pad,
            bytes_accessed=12 * B_pad),
    )(params, xt)

    flat = out.reshape(-1)               # contiguous (no copy) when unpadded
    if B_pad != B:
        flat = flat[:B]                  # only on the padded (small-B) path
    return flat.reshape(B, 1)


def perceptron_forward(x, w, b, **kwargs):
    """PyTorch-layout adapter. x: [B, 2] f32 -> [B, 1] f32.

    The x.T below is one extra HBM pass; producers that can emit feature-major
    [2, B] data should call perceptron_forward_feature_major directly.
    """
    return perceptron_forward_feature_major(
        jnp.asarray(x, jnp.float32).T, w, b, **kwargs)


if __name__ == "__main__":
    key = jax.random.PRNGKey(0)
    k_w, k_b, k_x = jax.random.split(key, 3)

    # nn.Linear(2, 1) init: U(-1/sqrt(in_features), 1/sqrt(in_features))
    bound = 1.0 / jnp.sqrt(2.0)
    w = jax.random.uniform(k_w, (1, 2), jnp.float32, -bound, bound)
    b = jax.random.uniform(k_b, (1,), jnp.float32, -bound, bound)

    # OR-function truth table plus a few random points; batch = 8
    x_truth = jnp.array([[0.0, 0.0], [0.0, 1.0], [1.0, 0.0], [1.0, 1.0]],
                        dtype=jnp.float32)
    x_rand = jax.random.uniform(k_x, (4, 2), jnp.float32)
    x = jnp.concatenate([x_truth, x_rand], axis=0)  # [8, 2]

    out = perceptron_forward(x, w, b)
    out = jax.block_until_ready(out)

    # Reference check in plain JAX
    ref = jax.nn.sigmoid(x @ w.T + b)
    assert out.shape == (8, 1)
    assert jnp.allclose(out, ref, atol=1e-5, rtol=1e-5)

    print("KERNEL_OK")
</pallas_src>

<mosaic_0001>
module attributes {stable_mosaic.version = 11 : i64} {
  func.func @_perceptron_kernel(%arg0: i32, %arg1: memref<3xf32, #tpu.memory_space<smem>>, %arg2: memref<2x8x128xf32, #tpu.memory_space<vmem>>, %arg3: memref<8x128xf32, #tpu.memory_space<vmem>>) attributes {dimension_semantics = [#tpu.dimension_semantics<parallel>], iteration_bounds = array<i64: 1>, scalar_prefetch = 0 : i64, scratch_operands = 0 : i64, tpu.core_type = #tpu.core_type<tc>, window_params = [{transform_indices = @transform_0, window_bounds = array<i64: 3>}, {transform_indices = @transform_1, window_bounds = array<i64: 2, 8, 128>}, {transform_indices = @transform_2, window_bounds = array<i64: 8, 128>}]} {
    %c0 = arith.constant 0 : index
    %0 = memref.load %arg1[%c0] : memref<3xf32, #tpu.memory_space<smem>>
    %c1 = arith.constant 1 : index
    %1 = memref.load %arg1[%c1] : memref<3xf32, #tpu.memory_space<smem>>
    %c2 = arith.constant 2 : index
    %2 = memref.load %arg1[%c2] : memref<3xf32, #tpu.memory_space<smem>>
    %c0_0 = arith.constant 0 : index
    %c0_1 = arith.constant 0 : index
    %c0_2 = arith.constant 0 : index
    %3 = vector.load %arg2[%c0_0, %c0_1, %c0_2] : memref<2x8x128xf32, #tpu.memory_space<vmem>>, vector<1x8x128xf32>
    %4 = vector.shape_cast %3 : vector<1x8x128xf32> to vector<8x128xf32>
    %c1_3 = arith.constant 1 : index
    %c0_4 = arith.constant 0 : index
    %c0_5 = arith.constant 0 : index
    %5 = vector.load %arg2[%c1_3, %c0_4, %c0_5] : memref<2x8x128xf32, #tpu.memory_space<vmem>>, vector<1x8x128xf32>
    %6 = vector.shape_cast %5 : vector<1x8x128xf32> to vector<8x128xf32>
    %7 = vector.broadcast %0 : f32 to vector<8x128xf32>
    %8 = arith.mulf %4, %7 : vector<8x128xf32>
    %9 = vector.broadcast %1 : f32 to vector<8x128xf32>
    %10 = arith.mulf %6, %9 : vector<8x128xf32>
    %11 = arith.addf %8, %10 : vector<8x128xf32>
    %12 = vector.broadcast %2 : f32 to vector<8x128xf32>
    %13 = arith.addf %11, %12 : vector<8x128xf32>
    %14 = arith.negf %13 : vector<8x128xf32>
    %15 = math.exp %14 : vector<8x128xf32>
    %cst = arith.constant 1.000000e+00 : f32
    %16 = vector.broadcast %cst : f32 to vector<8x128xf32>
    %17 = arith.addf %16, %15 : vector<8x128xf32>
    %18 = arith.divf %16, %17 : vector<8x128xf32>
    %c0_6 = arith.constant 0 : index
    %c0_7 = arith.constant 0 : index
    %19 = vector.load %arg3[%c0_6, %c0_7] : memref<8x128xf32, #tpu.memory_space<vmem>>, vector<8x128xf32>
    tpu.vector_store %arg3[%c0_6, %c0_7], %18 {strides = array<i32>} : memref<8x128xf32, #tpu.memory_space<vmem>>, vector<8x128xf32>,
    return
  }
  func.func @transform_0(%arg0: i32) -> i32 {
    %c0_i32 = arith.constant 0 : i32
    %c0_i32_0 = arith.constant 0 : i32
    return %c0_i32 : i32
  }
  func.func @transform_1(%arg0: i32) -> (i32, i32, i32) {
    %c0_i32 = arith.constant 0 : i32
    %c0_i32_0 = arith.constant 0 : i32
    %c0_i32_1 = arith.constant 0 : i32
    return %c0_i32, %arg0, %c0_i32_0 : i32, i32, i32
  }
  func.func @transform_2(%arg0: i32) -> (i32, i32) {
    %c0_i32 = arith.constant 0 : i32
    %c0_i32_0 = arith.constant 0 : i32
    return %arg0, %c0_i32 : i32, i32
  }
}

</mosaic_0001>

<bundles_post_ra>
// kernel: tpu_custom_call.1
= control target key start
LH: loop header
LB: loop body
LE: loop exit
PB: predicated region body
PF: predicated region fallthrough
CT: control target
= control target key end

     0   :  { %7 = vsyncpa [#allocation5], 0  ;;  %s168_s0 = inlined_call_operand.hbm [shape: f32[3], index: 0, kind: input, shape index: {}]   ;;  %s169_s1 = inlined_call_operand.hbm [shape: f32[2,8,128], index: 1, kind: input, shape index: {}]   ;;  %s170_s2 = inlined_call_operand.hbm [shape: f32[8,128], index: 2, kind: output, shape index: {}]  }
   0x1   :  { %8 = vsyncpa [#allocation3], 0 }
   0x2   :  { %9 = vsyncpa [#allocation4], 0  ;;  %s139_s9 = smov [#allocation2]   ;;  %s140_s12 = smov [#allocation6]  }
   0x3   :  { %17 = dma.hbm_to_smem %s168_s0, 16, %s139_s9, [#allocation5]  }
   0x4   :  { %s23_s13 = sshll.u32 %s140_s12, 4  ;;  %s24_s13 = int_to_ptr.vmem [resolvable:$true] %s23_s13 }
   0x5   :  { %s101_s14 = scalar_lea.vmem %s24_s13, 256  ;;  %p106_p1 = scmp.lt.s32.totalorder %s24_s13, %s24_s13 }
   0x6   :  { %p102_p0 = scmp.ne.s32.totalorder %s24_s13, %s101_s14  ;;  %p107_p2 = scmp.lt.s32.totalorder %s101_s14, %s101_s14 }
   0x8   :  { %p108_p3 = por %p107_p2, %p106_p1 }
   0xa   :  { %p109_p4 = pnand %p108_p3, %p102_p0 }
   0xc   :  { %112 = shalt.err (!%p109_p4)
}
   0xd   :  { %s141_s15 = smov 128   ;;  %s142_s16 = smov 8  }
   0xe   :  { %29 = dma.hbm_to_vmem [thread:$0]  %s169_s1, 256, %s24_s13, [#allocation3], %s141_s15, %s141_s15, %s142_s16  }
   0xf   :  { %133 = dma.done.wait [#allocation5], 16  }
  0x10   :  { %134 = vsyncadd [#allocation5], 4294967280 }
  0x11   :  { %135 = dma.done.wait [#allocation3], 256  }
  0x12   :  { %136 = vsyncadd [#allocation3], 4294967040 }
  0x13   :  { %36 = sfence }
  0x14   :  { %s37_s0 = sld [smem:[#allocation2]]  ;;  %v40_v0 = vld [vmem:[#allocation6] sm:$0xff]  ;;  %v42_v1 = vld [vmem:[#allocation6 + $0x8] sm:$0xff]  ;;  %s143_s1 = smov [#allocation7]  }
  0x15   :  { %s73_s19 = sld [smem:[#allocation2 + $0x1]]  ;;  %s63_s21 = sshll.u32 %s143_s1, 4  ;;  %s64_s21 = int_to_ptr.vmem [resolvable:$true] %s63_s21 }
  0x16   :  { %s74_s20 = sld [smem:[#allocation2 + $0x2]]  ;;  %s113_s22 = scalar_lea.vmem %s64_s21, 128 }
  0x17   :  { %p114_p5 = scmp.ne.s32.totalorder %s64_s21, %s113_s22  ;;  %p118_p6 = scmp.lt.s32.totalorder %s64_s21, %s64_s21 }
  0x18   :  { %p119_p7 = scmp.lt.s32.totalorder %s113_s22, %s113_s22 }
  0x1a   :  { %v43_v2 = vstv %s37_s0  ;;  %p120_p8 = por %p119_p7, %p118_p6 }
  0x1b   :  { %v44_v3 = vmul.f32 %v43_v2, %v40_v0  ;;  %v45_v4 = vstv %s73_s19 }
  0x1c   :  { %v46_v5 = vmul.f32 %v45_v4, %v42_v1  ;;  %v48_v6 = vstv %s74_s20  ;;  %p121_p9 = pnand %p120_p8, %p114_p5 }
  0x1e   :  { %v47_v7 = vadd.f32 %v46_v5, %v44_v3 }
  0x20   :  { %v49_v8 = vadd.f32 %v48_v6, %v47_v7 }
  0x22   :  { %v75_v9 = vmul.f32 -1.442695, %v49_v8 }
  0x24   :  { %81 = vpow2.f32 %v75_v9 }
  0x31   :  { %v82_v10 = vpop.eup %81 }
  0x32   :  { %v53_v11 = vadd.f32 1.0, %v82_v10 }
  0x34   :  { %83 = vrcp.f32 %v53_v11 }
  0x41   :  { %v84_v12 = vpop.eup %83 }
  0x42   :  { %56 = vst [vmem:[#allocation7] sm:$0xff] %v84_v12 }
  0x43   :  { %124 = shalt.err (!%p121_p9)
}
  0x44   :  { %66 = dma.vmem_to_hbm [thread:$0]  %s64_s21, 128, %s170_s2, [#allocation4]  }
  0x45   :  { %137 = dma.done.wait [#allocation4], 128  }
  0x46   :  { %138 = vsyncadd [#allocation4], 4294967168 }
  0x47   :  { %70 = vsyncpa [#allocation3], 1 }
  0x48   :  { %71 = vsyncpa [#allocation4], 1 }
  0x49   :  { %72 = vsyncpa [#allocation5], 1 }

</bundles_post_ra>
